<compile_context>
chip_gen: v7x
topology: tpu7x:2x2x1
jax: 0.10.0
libtpu: 0.0.40
codegen_flags: <defaults>
</compile_context>

<pallas_src>
import functools

import jax
import jax.numpy as jnp
import numpy as np
from jax.experimental import pallas as pl
from jax.experimental.pallas import tpu as pltpu


def _round_up(x, m):
    return ((x + m - 1) // m) * m


def _vmem_capacity_bytes():
    """Per-core VMEM capacity (generation aware); conservative fallback."""
    try:
        info = pltpu.get_tpu_info()
        cap = getattr(info, "vmem_capacity_bytes", None)
        if cap:
            return int(cap)
    except Exception:
        pass
    return 64 << 20  # v7x per-TensorCore VMEM; safe lower bound for v5e/v6e too


# ---------------------------------------------------------------------------
# Path 1: resident-table one-hot / MXU kernel (small & medium tables).
# ---------------------------------------------------------------------------
def _dense_map_onehot_kernel(coords_ref, emb_ref, out_ref, *, resolution):
    """One grid step = one batch tile.

    coords_ref : VMEM float32 [TB, 2]   raw (row, col) coords in [0, 1)
    emb_ref    : VMEM         [R2, D]   full table, resident (single copy)
    out_ref    : VMEM float32 [TB, D]   output tile
    """
    TB = coords_ref.shape[0]
    R2 = emb_ref.shape[0]
    res = resolution

    # ---- in-kernel glue: base corner + bilinear weights (tiny VPU work) ----
    x = coords_ref[...] * jnp.float32(res - 1)              # (TB, 2)
    # Clamp the base corner to resolution-2 so the +1 corners never index past
    # the table.  For inputs in [0, 1) this is a no-op and matches the PyTorch
    # module exactly; input == 1.0 (which would OOB-index in PyTorch) degrades
    # gracefully to the last cell instead of reading out of bounds.
    xi = jnp.clip(jnp.floor(x), 0.0, jnp.float32(res - 2))
    xf = x - xi                                              # (TB, 2)

    xr = xf[:, 0:1]                                          # (TB, 1)
    xc = xf[:, 1:2]
    base = (xi[:, 0:1] * jnp.float32(res) + xi[:, 1:2]).astype(jnp.int32)

    # Weighted one-hot scatter matrix S[b, r]: 4 corners at row-id offsets
    # {0, 1, res, res+1} from the base corner with bilinear weights.
    col = jax.lax.broadcasted_iota(jnp.int32, (TB, R2), 1)
    corners = (
        (0,       (1.0 - xr) * (1.0 - xc)),   # (r  , c  )
        (1,       (1.0 - xr) * xc),           # (r  , c+1)
        (res,     xr * (1.0 - xc)),           # (r+1, c  )
        (res + 1, xr * xc),                   # (r+1, c+1)
    )
    s = jnp.zeros((TB, R2), jnp.float32)
    for off, w in corners:                                   # static, unrolled
        s = s + jnp.where(col == base + off, w, jnp.float32(0.0))
    # TODO(synk): if a bundle dump shows the VALU (not the MXU) is the binding
    # slot here, build only the base one-hot and derive the other 3 corners via
    # static pltpu.roll shifts (1, res, res+1) on the otherwise-idle XLU.

    emb = emb_ref[...]
    if emb.dtype != jnp.float32:
        s = s.astype(emb.dtype)   # bf16 table => native bf16 MXU passes (v6e/v7x)

    # Gather + weighted sum == single MXU matmul against the resident table.
    out_ref[...] = jnp.dot(
        s, emb, preferred_element_type=jnp.float32
    ).astype(out_ref.dtype)


# ---------------------------------------------------------------------------
# Path 2: HBM row-gather kernel (large tables that must not live in VMEM).
# ---------------------------------------------------------------------------
def _dense_map_gather_kernel(ids_ref, w_ref, emb_hbm, out_ref, fbuf, sem, *, tile_b):
    """One grid step = one batch tile; the table stays in HBM.

    ids_ref : SMEM int32  [B_pad * 4]   flattened corner row ids (scalar prefetch)
    w_ref   : VMEM float32[TB, 4]       bilinear weight per corner
    emb_hbm : HBM         [R2, D]       full embedding table (memory_space=pl.ANY)
    out_ref : VMEM float32[TB, D]       output tile
    fbuf    : VMEM        [2, 4, TB, D] double-buffered gathered rows
    sem     : DMA semaphores [2]
    """
    i = pl.program_id(0)
    nsteps = pl.num_programs(0)
    tb = tile_b
    d = out_ref.shape[-1]

    def start_tile(tile_idx, slot):
        sample0 = tile_idx * tb
        for s in range(tb):                              # static unroll
            for n in range(4):
                rid = ids_ref[(sample0 + s) * 4 + n]
                pltpu.make_async_copy(
                    emb_hbm.at[pl.ds(rid, 1)],
                    fbuf.at[slot, n, pl.ds(s, 1)],
                    sem.at[slot],
                ).start()

    def wait_tile(slot):
        for _ in range(tb * 4):                          # one wait per issued copy
            pltpu.make_async_copy(
                emb_hbm.at[pl.ds(0, 1)],
                fbuf.at[slot, 0, pl.ds(0, 1)],
                sem.at[slot],
            ).wait()

    slot = i % 2

    @pl.when(i == 0)
    def _():                                             # prime the pipeline
        start_tile(0, 0)

    @pl.when(i + 1 < nsteps)
    def _():                                             # prefetch next tile
        start_tile(i + 1, 1 - slot)

    wait_tile(slot)

    # VPU weighted 4-corner sum for the current tile (lane-dense output store).
    w = w_ref[...]                                       # (TB, 4)
    acc = jnp.zeros((tb, d), jnp.float32)
    for n in range(4):
        acc = acc + w[:, n:n + 1] * fbuf[slot, n].astype(jnp.float32)
    out_ref[...] = acc.astype(out_ref.dtype)


# ---------------------------------------------------------------------------
# Wrapper
# ---------------------------------------------------------------------------
def prepare_embeddings(embeddings, table_dtype=jnp.float32):
    """Pad the feature dim to a lane multiple (128) and cast once.

    NOTE: this copies the whole table in HBM; callers should do it ONCE at
    parameter-init time and cache the result instead of per forward call.
    """
    _, D = embeddings.shape
    D_pad = _round_up(D, 128)
    if D_pad != D:
        embeddings = jnp.pad(embeddings, ((0, 0), (0, D_pad - D)))
    if embeddings.dtype != table_dtype:
        embeddings = embeddings.astype(table_dtype)
    return embeddings


def dense_map_forward(inputs, embeddings, resolution, *, path="auto", tile_b=None,
                      gather_tile_b=16, table_dtype=jnp.float32, max_onehot_r2=4096):
    """Pallas-backed forward pass matching DenseMap.forward.

    inputs     : [B, 2] coords in [0, 1)
    embeddings : [resolution**2, D] table (pre-padded/cast tables are used as-is)
    path       : "auto" | "onehot" | "gather"
    """
    assert inputs.ndim == 2 and inputs.shape[1] == 2
    assert resolution >= 2
    B = inputs.shape[0]
    R2, D = embeddings.shape
    assert R2 == resolution * resolution

    emb = prepare_embeddings(embeddings, table_dtype)   # no-op if caller pre-padded
    D_pad = emb.shape[1]
    esize = emb.dtype.itemsize

    vmem_cap = _vmem_capacity_bytes()
    vmem_budget = int(vmem_cap * 0.85)                  # headroom for compiler scratch

    def onehot_bytes(tb):
        table = R2 * D_pad * esize                       # single resident copy
        io = 2 * (tb * 2 * 4 + tb * D_pad * 4)           # double-buffered coords + out
        s_work = 2 * tb * R2 * 4                         # S + one live temporary
        return table + io + s_work + (4 << 20)

    if tile_b is None:
        # Bigger tiles amortize per-step overhead where VMEM allows (v5e/v6e).
        tile_b = 1024 if vmem_cap >= (96 << 20) else 512

    if path == "auto":
        use_gather = (R2 > max_onehot_r2) or (onehot_bytes(8) > vmem_budget)
    else:
        use_gather = (path == "gather")

    if not use_gather:
        # -------------------- resident-table one-hot / MXU path --------------------
        TB = _round_up(min(int(tile_b), _round_up(B, 8)), 8)
        while TB > 8 and onehot_bytes(TB) > vmem_budget:
            TB = _round_up(max(8, TB // 2), 8)
        B_pad = _round_up(B, TB)

        coords = inputs.astype(jnp.float32)
        if B_pad != B:
            coords = jnp.pad(coords, ((0, B_pad - B), (0, 0)))   # pads map to cell (0,0)

        kernel = functools.partial(_dense_map_onehot_kernel, resolution=resolution)

        def build(table_spec, limit):
            return pl.pallas_call(
                kernel,
                out_shape=jax.ShapeDtypeStruct((B_pad, D_pad), jnp.float32),
                grid_spec=pltpu.PrefetchScalarGridSpec(
                    num_scalar_prefetch=0,
                    grid=(B_pad // TB,),
                    in_specs=[
                        pl.BlockSpec((TB, 2), lambda i: (i, 0)),   # per-tile coords
                        table_spec,                                # resident table
                    ],
                    out_specs=pl.BlockSpec((TB, D_pad), lambda i: (i, 0)),
                ),
                compiler_params=pltpu.CompilerParams(
                    dimension_semantics=("parallel",),             # independent tiles
                    vmem_limit_bytes=int(min(max(limit, 32 << 20), vmem_budget))),
            )

        try:
            # Whole-array VMEM operand => SINGLE resident copy of the table.
            out = build(pl.BlockSpec(memory_space=pltpu.MemorySpace.VMEM),
                        onehot_bytes(TB))(coords, emb)
        except Exception:
            # Fallback (older Pallas): constant-index blocked spec (table is
            # double-buffered, so add its bytes to the limit).
            out = build(pl.BlockSpec((R2, D_pad), lambda i: (0, 0)),
                        onehot_bytes(TB) + R2 * D_pad * esize)(coords, emb)
    else:
        # ------------------------- HBM row-gather path -----------------------------
        TB = _round_up(max(8, min(int(gather_tile_b), _round_up(B, 8))), 8)
        B_pad = _round_up(B, TB)

        # Corner-id / weight glue (vectorized; tiny vs. the gather HBM traffic, and
        # the ids must land in SMEM for data-dependent DMA addressing).
        x = inputs.astype(jnp.float32) * (resolution - 1)
        xi = jnp.clip(jnp.floor(x).astype(jnp.int32), 0, resolution - 2)
        xf = x - xi.astype(jnp.float32)
        base = xi[:, 0] * resolution + xi[:, 1]                       # (B,)
        xr, xc = xf[:, 0:1], xf[:, 1:2]
        ids = jnp.stack(
            [base, base + 1, base + resolution, base + resolution + 1],
            axis=1).astype(jnp.int32)                                 # (B, 4)
        w = jnp.concatenate(
            [(1.0 - xr) * (1.0 - xc), (1.0 - xr) * xc,
             xr * (1.0 - xc), xr * xc], axis=1).astype(jnp.float32)   # (B, 4)

        if B_pad != B:
            ids = jnp.pad(ids, ((0, B_pad - B), (0, 0)))   # row 0 is a valid id
            w = jnp.pad(w, ((0, B_pad - B), (0, 0)))       # zero weight => no contribution
        ids_flat = ids.reshape(-1)                         # 1-D => compact SMEM padding

        need = (2 * 4 * TB * D_pad * esize      # double-buffered gather scratch
                + 2 * TB * D_pad * 4            # double-buffered output tiles
                + 2 * TB * 4 * 4                # weight tiles
                + (4 << 20))

        kernel = functools.partial(_dense_map_gather_kernel, tile_b=TB)

        out = pl.pallas_call(
            kernel,
            out_shape=jax.ShapeDtypeStruct((B_pad, D_pad), jnp.float32),
            grid_spec=pltpu.PrefetchScalarGridSpec(
                num_scalar_prefetch=1,                            # ids -> SMEM
                grid=(B_pad // TB,),
                in_specs=[
                    pl.BlockSpec((TB, 4), lambda i, ids: (i, 0)),  # weights
                    pl.BlockSpec(memory_space=pl.ANY),             # table stays in HBM
                ],
                out_specs=pl.BlockSpec((TB, D_pad), lambda i, ids: (i, 0)),
                scratch_shapes=[
                    pltpu.VMEM((2, 4, TB, D_pad), emb.dtype),
                    pltpu.SemaphoreType.DMA((2,)),
                ]),
            compiler_params=pltpu.CompilerParams(
                # Manual cross-step double buffering => the grid must stay sequential.
                dimension_semantics=("arbitrary",),
                vmem_limit_bytes=int(min(max(need, 32 << 20), vmem_budget))),
        )(ids_flat, w, emb)

    return out[:B, :D]


def dense_map_ref(inputs, embeddings, resolution):
    """Pure-JAX reference replicating the PyTorch forward (inputs in [0, 1))."""
    x = inputs * (resolution - 1)
    xi = jnp.floor(x).astype(jnp.int32)            # == trunc for x >= 0 (torch .long())
    xf = x - xi.astype(x.dtype)
    n = jnp.arange(4)
    bin_mask = (n[:, None] & (1 << jnp.arange(2))[None, :]) == 0   # (4, 2)
    xi_e = xi[:, None, :]
    xf_e = xf[:, None, :]
    neigs = jnp.where(bin_mask[None], xi_e, xi_e + 1)              # (B, 4, 2)
    ids = neigs[..., 0] * resolution + neigs[..., 1]               # (B, 4)
    feats_n = embeddings[ids]                                      # (B, 4, D)
    weights = jnp.where(bin_mask[None], 1 - xf_e, xf_e)            # (B, 4, 2)
    w = jnp.prod(weights, axis=-1, keepdims=True)                  # (B, 4, 1)
    return jnp.sum(feats_n * w, axis=-2)                           # (B, D)


if __name__ == "__main__":
    # Small shapes consistent with the module (resolution, map_num scaled down).
    feat_dim = 8
    resolution = 16
    map_num = 16
    D = map_num * feat_dim          # 128 (already lane-dense -> no table padding copy)
    B = 40

    key = jax.random.PRNGKey(0)
    k_emb, k_in = jax.random.split(key)

    # xavier_uniform-style init for embeddings [resolution**2, map_num*feat_dim].
    fan_out, fan_in = resolution ** 2, D
    bound = float(np.sqrt(6.0 / (fan_in + fan_out)))
    embeddings = jax.random.uniform(
        k_emb, (resolution ** 2, D), jnp.float32, minval=-bound, maxval=bound)

    # Inputs in [0, 1) (same assumption as the PyTorch module).
    inputs = jax.random.uniform(k_in, (B, 2), jnp.float32)

    ref = dense_map_ref(inputs, embeddings, resolution)

    # Resident-table one-hot/MXU path (small tile to exercise multiple grid steps).
    out_onehot = jax.block_until_ready(
        dense_map_forward(inputs, embeddings, resolution, path="onehot", tile_b=16))
    np.testing.assert_allclose(np.asarray(out_onehot), np.asarray(ref),
                               rtol=1e-5, atol=1e-5)

    # HBM-gather fallback path (auto-selected for large tables; forced here to test).
    out_gather = jax.block_until_ready(
        dense_map_forward(inputs, embeddings, resolution, path="gather",
                          gather_tile_b=16))
    np.testing.assert_allclose(np.asarray(out_gather), np.asarray(ref),
                               rtol=1e-5, atol=1e-5)

    assert out_onehot.shape == (B, D) and out_gather.shape == (B, D)
    print("KERNEL_OK")
</pallas_src>

<mosaic_0001>
module attributes {stable_mosaic.version = 11 : i64} {
  func.func @_dense_map_onehot_kernel(%arg0: i32, %arg1: memref<16x2xf32, #tpu.memory_space<vmem>>, %arg2: memref<256x128xf32, #tpu.memory_space<vmem>>, %arg3: memref<16x128xf32, #tpu.memory_space<vmem>>) attributes {dimension_semantics = [#tpu.dimension_semantics<parallel>], iteration_bounds = array<i64: 3>, scalar_prefetch = 0 : i64, scratch_operands = 0 : i64, tpu.core_type = #tpu.core_type<tc>, window_params = [{transform_indices = @transform_0, window_bounds = array<i64: 16, 2>}, {pipeline_mode = #tpu.pipeline_mode<synchronous>, transform_indices = @transform_1, window_bounds = array<i64: 256, 128>}, {transform_indices = @transform_2, window_bounds = array<i64: 16, 128>}]} {
    %c0 = arith.constant 0 : index
    %c0_0 = arith.constant 0 : index
    %0 = vector.load %arg1[%c0, %c0_0] : memref<16x2xf32, #tpu.memory_space<vmem>>, vector<16x2xf32>
    %cst = arith.constant 1.500000e+01 : f32
    %1 = vector.broadcast %cst : f32 to vector<16x2xf32>
    %2 = arith.mulf %0, %1 : vector<16x2xf32>
    %3 = math.floor %2 : vector<16x2xf32>
    %cst_1 = arith.constant 0.000000e+00 : f32
    %cst_2 = arith.constant 1.400000e+01 : f32
    %4 = vector.broadcast %cst_1 : f32 to vector<16x2xf32>
    %5 = arith.maximumf %4, %3 : vector<16x2xf32>
    %6 = vector.broadcast %cst_2 : f32 to vector<16x2xf32>
    %7 = arith.minimumf %6, %5 : vector<16x2xf32>
    %8 = arith.subf %2, %7 : vector<16x2xf32>
    %9 = vector.extract_strided_slice %8 {offsets = [0, 0], sizes = [16, 1], strides = [1, 1]} : vector<16x2xf32> to vector<16x1xf32>
    %10 = vector.extract_strided_slice %8 {offsets = [0, 1], sizes = [16, 1], strides = [1, 1]} : vector<16x2xf32> to vector<16x1xf32>
    %11 = vector.extract_strided_slice %7 {offsets = [0, 0], sizes = [16, 1], strides = [1, 1]} : vector<16x2xf32> to vector<16x1xf32>
    %cst_3 = arith.constant 1.600000e+01 : f32
    %12 = vector.broadcast %cst_3 : f32 to vector<16x1xf32>
    %13 = arith.mulf %11, %12 : vector<16x1xf32>
    %14 = vector.extract_strided_slice %7 {offsets = [0, 1], sizes = [16, 1], strides = [1, 1]} : vector<16x2xf32> to vector<16x1xf32>
    %15 = arith.addf %13, %14 : vector<16x1xf32>
    %16 = arith.fptosi %15 : vector<16x1xf32> to vector<16x1xi32>
    %17 = tpu.iota {dimensions = array<i32: 1>} : vector<16x256xi32>
    %cst_4 = arith.constant 1.000000e+00 : f32
    %18 = vector.broadcast %cst_4 : f32 to vector<16x1xf32>
    %19 = arith.subf %18, %9 : vector<16x1xf32>
    %cst_5 = arith.constant 1.000000e+00 : f32
    %20 = vector.broadcast %cst_5 : f32 to vector<16x1xf32>
    %21 = arith.subf %20, %10 : vector<16x1xf32>
    %22 = arith.mulf %19, %21 : vector<16x1xf32>
    %cst_6 = arith.constant 1.000000e+00 : f32
    %23 = vector.broadcast %cst_6 : f32 to vector<16x1xf32>
    %24 = arith.subf %23, %9 : vector<16x1xf32>
    %25 = arith.mulf %24, %10 : vector<16x1xf32>
    %cst_7 = arith.constant 1.000000e+00 : f32
    %26 = vector.broadcast %cst_7 : f32 to vector<16x1xf32>
    %27 = arith.subf %26, %10 : vector<16x1xf32>
    %28 = arith.mulf %9, %27 : vector<16x1xf32>
    %29 = arith.mulf %9, %10 : vector<16x1xf32>
    %cst_8 = arith.constant 0.000000e+00 : f32
    %30 = vector.broadcast %cst_8 : f32 to vector<16x256xf32>
    %c0_i32 = arith.constant 0 : i32
    %31 = vector.broadcast %c0_i32 : i32 to vector<16x1xi32>
    %32 = arith.addi %16, %31 : vector<16x1xi32>
    %33 = vector.broadcast %32 : vector<16x1xi32> to vector<16x256xi32>
    %34 = arith.cmpi eq, %17, %33 : vector<16x256xi32>
    %cst_9 = arith.constant 0.000000e+00 : f32
    %35 = vector.shape_cast %22 : vector<16x1xf32> to vector<16x1xf32>
    %36 = vector.broadcast %35 : vector<16x1xf32> to vector<16x256xf32>
    %37 = vector.broadcast %cst_9 : f32 to vector<16x256xf32>
    %38 = arith.select %34, %36, %37 : vector<16x256xi1>, vector<16x256xf32>
    %39 = arith.addf %30, %38 : vector<16x256xf32>
    %c1_i32 = arith.constant 1 : i32
    %40 = vector.broadcast %c1_i32 : i32 to vector<16x1xi32>
    %41 = arith.addi %16, %40 : vector<16x1xi32>
    %42 = vector.broadcast %41 : vector<16x1xi32> to vector<16x256xi32>
    %43 = arith.cmpi eq, %17, %42 : vector<16x256xi32>
    %cst_10 = arith.constant 0.000000e+00 : f32
    %44 = vector.shape_cast %25 : vector<16x1xf32> to vector<16x1xf32>
    %45 = vector.broadcast %44 : vector<16x1xf32> to vector<16x256xf32>
    %46 = vector.broadcast %cst_10 : f32 to vector<16x256xf32>
    %47 = arith.select %43, %45, %46 : vector<16x256xi1>, vector<16x256xf32>
    %48 = arith.addf %39, %47 : vector<16x256xf32>
    %c16_i32 = arith.constant 16 : i32
    %49 = vector.broadcast %c16_i32 : i32 to vector<16x1xi32>
    %50 = arith.addi %16, %49 : vector<16x1xi32>
    %51 = vector.broadcast %50 : vector<16x1xi32> to vector<16x256xi32>
    %52 = arith.cmpi eq, %17, %51 : vector<16x256xi32>
    %cst_11 = arith.constant 0.000000e+00 : f32
    %53 = vector.shape_cast %28 : vector<16x1xf32> to vector<16x1xf32>
    %54 = vector.broadcast %53 : vector<16x1xf32> to vector<16x256xf32>
    %55 = vector.broadcast %cst_11 : f32 to vector<16x256xf32>
    %56 = arith.select %52, %54, %55 : vector<16x256xi1>, vector<16x256xf32>
    %57 = arith.addf %48, %56 : vector<16x256xf32>
    %c17_i32 = arith.constant 17 : i32
    %58 = vector.broadcast %c17_i32 : i32 to vector<16x1xi32>
    %59 = arith.addi %16, %58 : vector<16x1xi32>
    %60 = vector.broadcast %59 : vector<16x1xi32> to vector<16x256xi32>
    %61 = arith.cmpi eq, %17, %60 : vector<16x256xi32>
    %cst_12 = arith.constant 0.000000e+00 : f32
    %62 = vector.shape_cast %29 : vector<16x1xf32> to vector<16x1xf32>
    %63 = vector.broadcast %62 : vector<16x1xf32> to vector<16x256xf32>
    %64 = vector.broadcast %cst_12 : f32 to vector<16x256xf32>
    %65 = arith.select %61, %63, %64 : vector<16x256xi1>, vector<16x256xf32>
    %66 = arith.addf %57, %65 : vector<16x256xf32>
    %c0_13 = arith.constant 0 : index
    %c0_14 = arith.constant 0 : index
    %67 = vector.load %arg2[%c0_13, %c0_14] : memref<256x128xf32, #tpu.memory_space<vmem>>, vector<256x128xf32>
    %cst_15 = arith.constant dense<0.000000e+00> : vector<16x128xf32>
    %68 = tpu.matmul %66, %67, %cst_15 {dimension_numbers = #tpu.dot_dimension_numbers<[1], [0], [0], [1], [0, 0, 1, 1], [], []>} : vector<16x256xf32>, vector<256x128xf32>, vector<16x128xf32> -> vector<16x128xf32>
    %c0_16 = arith.constant 0 : index
    %c0_17 = arith.constant 0 : index
    %69 = vector.load %arg3[%c0_16, %c0_17] : memref<16x128xf32, #tpu.memory_space<vmem>>, vector<16x128xf32>
    tpu.vector_store %arg3[%c0_16, %c0_17], %68 {strides = array<i32>} : memref<16x128xf32, #tpu.memory_space<vmem>>, vector<16x128xf32>,
    return
  }
  func.func @transform_0(%arg0: i32) -> (i32, i32) {
    %c0_i32 = arith.constant 0 : i32
    %c0_i32_0 = arith.constant 0 : i32
    return %arg0, %c0_i32 : i32, i32
  }
  func.func @transform_1(%arg0: i32) -> (i32, i32) {
    %c0_i32 = arith.constant 0 : i32
    %c0_i32_0 = arith.constant 0 : i32
    %c0_i32_1 = arith.constant 0 : i32
    return %c0_i32, %c0_i32_0 : i32, i32
  }
  func.func @transform_2(%arg0: i32) -> (i32, i32) {
    %c0_i32 = arith.constant 0 : i32
    %c0_i32_0 = arith.constant 0 : i32
    return %arg0, %c0_i32 : i32, i32
  }
}

module attributes {stable_mosaic.version = 11 : i64} {
  func.func @_dense_map_onehot_kernel(%arg0: i32, %arg1: memref<16x2xf32, #tpu.memory_space<vmem>>, %arg2: memref<256x128xf32, #tpu.memory_space<vmem>>, %arg3: memref<16x128xf32, #tpu.memory_space<vmem>>) attributes {dimension_semantics = [#tpu.dimension_semantics<parallel>], iteration_bounds = array<i64: 3>, scalar_prefetch = 0 : i64, scratch_operands = 0 : i64, tpu.core_type = #tpu.core_type<tc>, window_params = [{transform_indices = @transform_0, window_bounds = array<i64: 16, 2>}, {pipeline_mode = #tpu.pipeline_mode<synchronous>, transform_indices = @transform_1, window_bounds = array<i64: 256, 128>}, {transform_indices = @transform_2, window_bounds = array<i64: 16, 128>}]} {
    %c0 = arith.constant 0 : index
    %c0_0 = arith.constant 0 : index
    %0 = vector.load %arg1[%c0, %c0_0] : memref<16x2xf32, #tpu.memory_space<vmem>>, vector<16x2xf32>
    %cst = arith.constant 1.500000e+01 : f32
    %1 = vector.broadcast %cst : f32 to vector<16x2xf32>
    %2 = arith.mulf %0, %1 : vector<16x2xf32>
    %3 = math.floor %2 : vector<16x2xf32>
    %cst_1 = arith.constant 0.000000e+00 : f32
    %cst_2 = arith.constant 1.400000e+01 : f32
    %4 = vector.broadcast %cst_1 : f32 to vector<16x2xf32>
    %5 = arith.maximumf %4, %3 : vector<16x2xf32>
    %6 = vector.broadcast %cst_2 : f32 to vector<16x2xf32>
    %7 = arith.minimumf %6, %5 : vector<16x2xf32>
    %8 = arith.subf %2, %7 : vector<16x2xf32>
    %9 = vector.extract_strided_slice %8 {offsets = [0, 0], sizes = [16, 1], strides = [1, 1]} : vector<16x2xf32> to vector<16x1xf32>
    %10 = vector.extract_strided_slice %8 {offsets = [0, 1], sizes = [16, 1], strides = [1, 1]} : vector<16x2xf32> to vector<16x1xf32>
    %11 = vector.extract_strided_slice %7 {offsets = [0, 0], sizes = [16, 1], strides = [1, 1]} : vector<16x2xf32> to vector<16x1xf32>
    %cst_3 = arith.constant 1.600000e+01 : f32
    %12 = vector.broadcast %cst_3 : f32 to vector<16x1xf32>
    %13 = arith.mulf %11, %12 : vector<16x1xf32>
    %14 = vector.extract_strided_slice %7 {offsets = [0, 1], sizes = [16, 1], strides = [1, 1]} : vector<16x2xf32> to vector<16x1xf32>
    %15 = arith.addf %13, %14 : vector<16x1xf32>
    %16 = arith.fptosi %15 : vector<16x1xf32> to vector<16x1xi32>
    %17 = tpu.iota {dimensions = array<i32: 1>} : vector<16x256xi32>
    %cst_4 = arith.constant 1.000000e+00 : f32
    %18 = vector.broadcast %cst_4 : f32 to vector<16x1xf32>
    %19 = arith.subf %18, %9 : vector<16x1xf32>
    %cst_5 = arith.constant 1.000000e+00 : f32
    %20 = vector.broadcast %cst_5 : f32 to vector<16x1xf32>
    %21 = arith.subf %20, %10 : vector<16x1xf32>
    %22 = arith.mulf %19, %21 : vector<16x1xf32>
    %cst_6 = arith.constant 1.000000e+00 : f32
    %23 = vector.broadcast %cst_6 : f32 to vector<16x1xf32>
    %24 = arith.subf %23, %9 : vector<16x1xf32>
    %25 = arith.mulf %24, %10 : vector<16x1xf32>
    %cst_7 = arith.constant 1.000000e+00 : f32
    %26 = vector.broadcast %cst_7 : f32 to vector<16x1xf32>
    %27 = arith.subf %26, %10 : vector<16x1xf32>
    %28 = arith.mulf %9, %27 : vector<16x1xf32>
    %29 = arith.mulf %9, %10 : vector<16x1xf32>
    %cst_8 = arith.constant 0.000000e+00 : f32
    %30 = vector.broadcast %cst_8 : f32 to vector<16x256xf32>
    %c0_i32 = arith.constant 0 : i32
    %31 = vector.broadcast %c0_i32 : i32 to vector<16x1xi32>
    %32 = arith.addi %16, %31 : vector<16x1xi32>
    %33 = vector.broadcast %32 : vector<16x1xi32> to vector<16x256xi32>
    %34 = arith.cmpi eq, %17, %33 : vector<16x256xi32>
    %cst_9 = arith.constant 0.000000e+00 : f32
    %35 = vector.shape_cast %22 : vector<16x1xf32> to vector<16x1xf32>
    %36 = vector.broadcast %35 : vector<16x1xf32> to vector<16x256xf32>
    %37 = vector.broadcast %cst_9 : f32 to vector<16x256xf32>
    %38 = arith.select %34, %36, %37 : vector<16x256xi1>, vector<16x256xf32>
    %39 = arith.addf %30, %38 : vector<16x256xf32>
    %c1_i32 = arith.constant 1 : i32
    %40 = vector.broadcast %c1_i32 : i32 to vector<16x1xi32>
    %41 = arith.addi %16, %40 : vector<16x1xi32>
    %42 = vector.broadcast %41 : vector<16x1xi32> to vector<16x256xi32>
    %43 = arith.cmpi eq, %17, %42 : vector<16x256xi32>
    %cst_10 = arith.constant 0.000000e+00 : f32
    %44 = vector.shape_cast %25 : vector<16x1xf32> to vector<16x1xf32>
    %45 = vector.broadcast %44 : vector<16x1xf32> to vector<16x256xf32>
    %46 = vector.broadcast %cst_10 : f32 to vector<16x256xf32>
    %47 = arith.select %43, %45, %46 : vector<16x256xi1>, vector<16x256xf32>
    %48 = arith.addf %39, %47 : vector<16x256xf32>
    %c16_i32 = arith.constant 16 : i32
    %49 = vector.broadcast %c16_i32 : i32 to vector<16x1xi32>
    %50 = arith.addi %16, %49 : vector<16x1xi32>
    %51 = vector.broadcast %50 : vector<16x1xi32> to vector<16x256xi32>
    %52 = arith.cmpi eq, %17, %51 : vector<16x256xi32>
    %cst_11 = arith.constant 0.000000e+00 : f32
    %53 = vector.shape_cast %28 : vector<16x1xf32> to vector<16x1xf32>
    %54 = vector.broadcast %53 : vector<16x1xf32> to vector<16x256xf32>
    %55 = vector.broadcast %cst_11 : f32 to vector<16x256xf32>
    %56 = arith.select %52, %54, %55 : vector<16x256xi1>, vector<16x256xf32>
    %57 = arith.addf %48, %56 : vector<16x256xf32>
    %c17_i32 = arith.constant 17 : i32
    %58 = vector.broadcast %c17_i32 : i32 to vector<16x1xi32>
    %59 = arith.addi %16, %58 : vector<16x1xi32>
    %60 = vector.broadcast %59 : vector<16x1xi32> to vector<16x256xi32>
    %61 = arith.cmpi eq, %17, %60 : vector<16x256xi32>
    %cst_12 = arith.constant 0.000000e+00 : f32
    %62 = vector.shape_cast %29 : vector<16x1xf32> to vector<16x1xf32>
    %63 = vector.broadcast %62 : vector<16x1xf32> to vector<16x256xf32>
    %64 = vector.broadcast %cst_12 : f32 to vector<16x256xf32>
    %65 = arith.select %61, %63, %64 : vector<16x256xi1>, vector<16x256xf32>
    %66 = arith.addf %57, %65 : vector<16x256xf32>
    %c0_13 = arith.constant 0 : index
    %c0_14 = arith.constant 0 : index
    %67 = vector.load %arg2[%c0_13, %c0_14] : memref<256x128xf32, #tpu.memory_space<vmem>>, vector<256x128xf32>
    %cst_15 = arith.constant dense<0.000000e+00> : vector<16x128xf32>
    %68 = tpu.matmul %66, %67, %cst_15 {dimension_numbers = #tpu.dot_dimension_numbers<[1], [0], [0], [1], [0, 0, 1, 1], [], []>} : vector<16x256xf32>, vector<256x128xf32>, vector<16x128xf32> -> vector<16x128xf32>
    %c0_16 = arith.constant 0 : index
    %c0_17 = arith.constant 0 : index
    %69 = vector.load %arg3[%c0_16, %c0_17] : memref<16x128xf32, #tpu.memory_space<vmem>>, vector<16x128xf32>
    tpu.vector_store %arg3[%c0_16, %c0_17], %68 {strides = array<i32>} : memref<16x128xf32, #tpu.memory_space<vmem>>, vector<16x128xf32>,
    return
  }
  func.func @transform_0(%arg0: i32) -> (i32, i32) {
    %c0_i32 = arith.constant 0 : i32
    %c0_i32_0 = arith.constant 0 : i32
    return %arg0, %c0_i32 : i32, i32
  }
  func.func @transform_1(%arg0: i32) -> (i32, i32) {
    %c0_i32 = arith.constant 0 : i32
    %c0_i32_0 = arith.constant 0 : i32
    %c0_i32_1 = arith.constant 0 : i32
    return %c0_i32, %c0_i32_0 : i32, i32
  }
  func.func @transform_2(%arg0: i32) -> (i32, i32) {
    %c0_i32 = arith.constant 0 : i32
    %c0_i32_0 = arith.constant 0 : i32
    return %arg0, %c0_i32 : i32, i32
  }
}

</mosaic_0001>

<bundles_post_ra>
// kernel: tpu_custom_call.1
= control target key start
LH: loop header
LB: loop body
LE: loop exit
PB: predicated region body
PF: predicated region fallthrough
CT: control target
= control target key end

     0   :  { %7 = vsyncpa [#allocation3], 0  ;;  %s975_s0 = inlined_call_operand.vmem [shape: f32[48,2], index: 0, kind: input, shape index: {}]   ;;  %s976_s1 = inlined_call_operand.hbm [shape: f32[256,128], index: 1, kind: input, shape index: {}]   ;;  %s977_s2 = inlined_call_operand.hbm [shape: f32[48,128], index: 2, kind: output, shape index: {}]  }
   0x1   :  { %8 = vsyncpa [#allocation4], 0 }
   0x2   :  { %10 = vsyncpa [#allocation4 + $0x1], 0  ;;  %s812_s9 = smov 0   ;;  %s814_s10 = smov 0  }
   0x3   :  { %s816_s11 = smov 0   ;;  %s818_s12 = smov 0  }
   0x4 LB: > { %s833_s13 = sadd.s32 4294967295, %s787_s12   ;;  %s530_s14 = sadd.s32 4294967294, %s787_s12   ;;  %s787_s12 = sphi %s818_s12, %s993_s12   ;;  %s783_s11 = sphi %s816_s11, %s992_s11   ;;  %s779_s10 = sphi %s814_s10, %s991_s10   ;;  %s775_s9 = sphi %s812_s9, %s990_s9  }
   0x5   : > { %s837_s15 = sadd.s32 1, %s787_s12   ;;  %s70_s16 = sadd.s32 1, %s783_s11 }
   0x6   : > { %s67_s17 = ssub.s32 %s787_s12, %s837_s15  ;;  %p80_p0 = scmp.ne.s32.totalorder %s783_s11, %s779_s10 }
   0x7   : > { %p68_p1 = scmp.eq.s32.totalorder %s67_s17, 0  ;;  %p81_p2 = scmp.eq.s32.totalorder %s833_s13, 2 }
   0x8   : > { %p86_p3 = scmp.ne.s32.totalorder %s779_s10, %s775_s9  ;;  %p87_p4 = scmp.eq.s32.totalorder %s530_s14, 2 }
   0x9   : > { %s848_s18 = scalar_select %p68_p1, %s783_s11, %s70_s16  }
   0xa   : > { %p850_p5 = por %p81_p2, %p80_p0  ;;  %p854_p6 = por %p87_p4, %p86_p3 }
   0xb   : > { %p531_p7 = scmp.ge.s32.totalorder %s787_s12, 1  ;;  %p94_p8 = scmp.lt.s32.totalorder %s787_s12, 4 }
   0xc   : > { %s981_s19 = scalar_select %p850_p5, 1, 0 }
   0xd   : > { %s982_s20 = scalar_select %p854_p6, 1, 0 }
   0xe   : > { %p978_p9 = scmp.eq.s32.totalorder %s833_s13, 0  ;;  %p861_p10 = pnand %p531_p7, %p94_p8 }
   0xf   : > { %s789_s22 = smov [#allocation2]   ;;  %s693_s27 = scalar_lea.hbm %s976_s1, 4096 }
  0x10   : > { %s983_s21 = scalar_select %p861_p10, 1, 0 }
  0x11   : > { %s106_s23 = sshll.u32 %s789_s22, 4  ;;  %p641_p11 = pneg %p861_p10  ;;  %s107_s23 = int_to_ptr.vmem [resolvable:$true] %s106_s23 }
  0x12   : > { %p694_p13 = scmp.ne.s32.totalorder %s976_s1, %s693_s27  ;;  %p700_p3 = scmp.lt.u32.totalorder %s693_s27, %s976_s1 }
  0x13   : > { %p869_p12 = pnand %p978_p9, %p641_p11 }
  0x15   : > { %p695_p0 = pneg %p869_p12 }
  0x17   : > { %p696_p1 = pnand %p695_p0, %p694_p13 }
  0x19   : > { %p697_p2 = pneg %p696_p1 }
  0x1b   : > { %p702_p4 = pnand %p700_p3, %p697_p2 }
  0x1d   : > { %705 = shalt.err (!%p702_p4)
}
  0x1e   : > { %s706_s4 = scalar_lea.vmem %s107_s23, 4096  ;;  %p714_p9 = scmp.lt.s32.totalorder %s107_s23, %s107_s23 }
  0x1f   : > { %p707_p7 = scmp.ne.s32.totalorder %s107_s23, %s706_s4  ;;  %p715_p6 = scmp.lt.s32.totalorder %s706_s4, %s706_s4 }
  0x21   : > { %p709_p8 = pnand %p707_p7, %p695_p0  ;;  %p716_p5 = por %p715_p6, %p714_p9 }
  0x23   : > { %p710_p11 = pneg %p709_p8 }
  0x25   : > { %p717_p10 = pnand %p716_p5, %p710_p11 }
  0x27   : > { %720 = shalt.err (!%p717_p10)
}
  0x28   : > { %s790_s5 = smov 128   ;;  %s791_s6 = smov 8  }
  0x29   : > { %644 = dma.hbm_to_vmem [thread:$0]  (!%p869_p12), %s976_s1, 4096, %s107_s23, [#allocation3], %s790_s5, %s790_s5, %s791_s6  }
  0x2a   : > { %p985_p13 = scmp.ne.s32.totalorder %s983_s21, 0 }
  0x2b   : > { %p986_p1 = scmp.eq.s32.totalorder (!%p985_p13), %s833_s13, 0 }
  0x2c   : > { %131 = sbr.rel (%p985_p13) target bundleno = 586 (0x24a), region = 28 }
  0x33   : > { %766 = dma.done.wait (%p986_p1), [#allocation3], 4096   ;;  %p987_p0 = pmov %p986_p1 }
  0x34   : > { %s537_s14 = sshll.u32 %s833_s13, 1  ;;  %v792_v8 = vmov 0   ;;  %s793_s21 = smov 127   ;;  %v349_v26 = vld [vmem:[#allocation2 + $0x80] sm:$0xff]  ;;  %v350_v27 = vld [vmem:[#allocation2 + $0x88] sm:$0xff]  ;;  %v351_v36 = vld [vmem:[#allocation2 + $0x90] sm:$0xff] }
  0x35   : > { %768 = vsyncadd (%p987_p0), [#allocation3], 4294963200  ;;  %p154_p5 = scmp.lt.s32.totalorder %s537_s14, 5  ;;  %691 = vset.pattern.permute.xlu1 %v792_v8  ;;  %692 = vset.pattern.permute.xlu0 %v792_v8  ;;  %v583_v28 = vpack.c.bf16 %v350_v27, %v349_v26  ;;  %v333_v29 = vld [vmem:[#allocation2] sm:$0xff]  ;;  %v334_v30 = vld [vmem:[#allocation2 + $0x8] sm:$0xff]  ;;  %s150_s23 = sand.u32 1, %s779_s10  }
  0x36   : > { %v585_v32 = vpack.c.bf16 %v334_v30, %v333_v29  ;;  %v352_v37 = vld [vmem:[#allocation2 + $0x98] sm:$0xff]  ;;  %v335_v39 = vld [vmem:[#allocation2 + $0x10] sm:$0xff]  ;;  %v353_v44 = vld [vmem:[#allocation2 + $0xa0] sm:$0xff]  ;;  %s536_s25 = sshll.u32 %s150_s23, 4  ;;  %s544_s28 = sshll.u32 %s833_s13, 8 }
  0x37   : > { %s995_s14 = smov (!%p154_p5, %s537_s14), 5  ;;  %584 = vmatprep.subr.bf16.mxu0 %v583_v28  ;;  %615 = vmatprep.subr.bf16.mxu1 %v583_v28  ;;  %v587_v38 = vpack.c.bf16 %v352_v37, %v351_v36  ;;  %v336_v40 = vld [vmem:[#allocation2 + $0x18] sm:$0xff]  ;;  %v354_v45 = vld [vmem:[#allocation2 + $0xa8] sm:$0xff]  ;;  %v337_v47 = vld [vmem:[#allocation2 + $0x20] sm:$0xff]  ;;  %s152_s26 = scalar_lea.vmem [#allocation5], %s536_s25 }
  0x38   : > { %s538_s16 = sshll.u32 %s995_s14, 3  ;;  %586 = vmatpush3.bf16.msra.mxu0 %v585_v32  ;;  %623 = vmatpush3.bf16.msra.mxu1 %v585_v32  ;;  %v589_v41 = vpack.c.bf16 %v336_v40, %v335_v39  ;;  %v591_v46 = vpack.c.bf16 %v354_v45, %v353_v44  ;;  %v338_v48 = vld [vmem:[#allocation2 + $0x28] sm:$0xff]  ;;  %v355_v52 = vld [vmem:[#allocation2 + $0xb0] sm:$0xff]  ;;  %v356_v53 = vld [vmem:[#allocation2 + $0xb8] sm:$0xff]  ;;  %s456_s27 = sshll.u32 %s152_s26, 4  ;;  %s927_s27 = int_to_ptr.vmem [resolvable:$true] %s456_s27 }
  0x39   : > { %s157_s24 = scalar_lea.vmem %s975_s0, %s538_s16  ;;  %588 = vmatprep.subr.bf16.mxu0 %v587_v38  ;;  %616 = vmatprep.subr.bf16.mxu1 %v587_v38  ;;  %v593_v49 = vpack.c.bf16 %v338_v48, %v337_v47  ;;  %v595_v54 = vpack.c.bf16 %v356_v53, %v355_v52  ;;  %v339_v55 = vld [vmem:[#allocation2 + $0x30] sm:$0xff]  ;;  %v340_v56 = vld [vmem:[#allocation2 + $0x38] sm:$0xff]  ;;  %v357_v60 = vld [vmem:[#allocation2 + $0xc0] sm:$0xff]  ;;  %s932_s3 = scalar_lea.hbm %s977_s2, %s544_s28 }
  0x3a   : > { %v160_v0 = vld [vmem:[%s157_s24] sm:$0xff]  ;;  %v161_v1 = vld [vmem:[%s157_s24 + $0x8] sm:$0xff]  ;;  %v597_v57 = vpack.c.bf16 %v340_v56, %v339_v55  ;;  %v344_v8 = vld [vmem:[#allocation2 + $0x58] sm:$0xff]  ;;  %s934_s4 = scalar_lea.sflag [#allocation4], %s150_s23  ;;  %s721_s5 = scalar_lea.vmem %s927_s27, 256 }
  0x3b   : > { %v162_v2 = vmul.f32 15.0, %v160_v0  ;;  %v163_v3 = vmul.f32 15.0, %v161_v1  ;;  %v358_v61 = vld [vmem:[#allocation2 + $0xc8] sm:$0xff]  ;;  %v341_v63 = vld [vmem:[#allocation2 + $0x40] sm:$0xff]  ;;  %v347_v26 = vld [vmem:[#allocation2 + $0x70] sm:$0xff]  ;;  %p722_p6 = scmp.ne.s32.totalorder %s927_s27, %s721_s5  ;;  %p988_p9 = scmp.ne.s32.totalorder %s981_s19, 0 }
  0x3c   : > { %590 = vmatpush3.bf16.msra.mxu0 %v589_v41  ;;  %624 = vmatpush3.bf16.msra.mxu1 %v589_v41  ;;  %v599_v62 = vpack.c.bf16 %v358_v61, %v357_v60  ;;  %v342_v0 = vld [vmem:[#allocation2 + $0x48] sm:$0xff]  ;;  %v348_v27 = vld [vmem:[#allocation2 + $0x78] sm:$0xff]  ;;  %s794_s13 = smov [#allocation5]  }
  0x3d   : > { %v164_v4 = vfloor.f32 %v162_v2  ;;  %v165_v5 = vfloor.f32 %v163_v3  ;;  %592 = vmatprep.subr.bf16.mxu0 %v591_v46  ;;  %617 = vmatprep.subr.bf16.mxu1 %v591_v46  ;;  %v601_v1 = vpack.c.bf16 %v342_v0, %v341_v63  ;;  %v613_v28 = vpack.c.bf16 %v348_v27, %v347_v26  ;;  %p723_p10 = pnand %p722_p6, %p988_p9  ;;  %s725_s6 = sshll.u32 %s794_s13, 4  ;;  %s726_s6 = int_to_ptr.vmem [resolvable:$false] %s725_s6 }
  0x3e   : > { %s727_s7 = scalar_lea.vmem %s726_s6, 512  ;;  %p728_p2 = scmp.lt.s32.totalorder %s927_s27, %s726_s6 }
  0x3f   : > { %v166_v6 = vmax.f32 %v164_v4, 0.0  ;;  %v167_v7 = vmax.f32 %v165_v5, 0.0  ;;  %v359_v4 = vld [vmem:[#allocation2 + $0xd0] sm:$0xff]  ;;  %v360_v5 = vld [vmem:[#allocation2 + $0xd8] sm:$0xff]  ;;  %p724_p12 = pneg %p723_p10  ;;  %p729_p3 = scmp.lt.s32.totalorder %s727_s7, %s721_s5 }
  0x40   : > { %594 = vmatpush3.bf16.msra.mxu0 %v593_v49  ;;  %625 = vmatpush3.bf16.msra.mxu1 %v593_v49 }
  0x41   : > { %v168_v9 = vmin.f32 %v166_v6, 14.0  ;;  %v169_v10 = vmin.f32 %v167_v7, 14.0  ;;  %596 = vmatprep.subr.bf16.mxu0 %v595_v54  ;;  %618 = vmatprep.subr.bf16.mxu1 %v595_v54  ;;  %v603_v6 = vpack.c.bf16 %v360_v5, %v359_v4  ;;  %v343_v7 = vld [vmem:[#allocation2 + $0x50] sm:$0xff]  ;;  %p730_p4 = por %p729_p3, %p728_p2 }
  0x43   : > { %176 = vrot.lane.b32.xlu0 %v168_v9, %s793_s21  ;;  %v899_v11 = vsub.f32 %v162_v2, %v168_v9  ;;  %v901_v12 = vsub.f32 %v163_v3, %v169_v10  ;;  %v173_v16 = vmul.f32 16.0, %v169_v10  ;;  %v172_v19 = vmul.f32 16.0, %v168_v9  ;;  %p731_p7 = pnand %p730_p4, %p724_p12 }
  0x44   : > { %598 = vmatpush3.bf16.msra.mxu0 %v597_v57  ;;  %626 = vmatpush3.bf16.msra.mxu1 %v597_v57  ;;  %v605_v9 = vpack.c.bf16 %v344_v8, %v343_v7 }
  0x45   : > { %v189_v13 = vsub.f32 1.0, %v899_v11  ;;  %v190_v14 = vsub.f32 1.0, %v901_v12  ;;  %600 = vmatprep.subr.bf16.mxu0 %v599_v62  ;;  %619 = vmatprep.subr.bf16.mxu1 %v599_v62 }
  0x47   : > { %178 = vrot.lane.b32.xlu0 %v169_v10, %s793_s21  ;;  %193 = vrot.lane.b32.xlu1 %v189_v13, %s793_s21 }
  0x48   : > { %602 = vmatpush3.bf16.msra.mxu0 %v601_v1  ;;  %627 = vmatpush3.bf16.msra.mxu1 %v601_v1 }
  0x49   : > { %604 = vmatprep.subr.bf16.mxu0 %v603_v6  ;;  %620 = vmatprep.subr.bf16.mxu1 %v603_v6 }
  0x4b   : > { %203 = vrot.lane.b32.xlu0 %v899_v11, %s793_s21  ;;  %195 = vrot.lane.b32.xlu1 %v190_v14, %s793_s21 }
  0x4c   : > { %606 = vmatpush3.bf16.msra.mxu0 %v605_v9  ;;  %628 = vmatpush3.bf16.msra.mxu1 %v605_v9 }
  0x4f   : > { %205 = vrot.lane.b32.xlu1 %v901_v12, %s793_s21 }
  0xb5   : > { %v177_v15 = vpop.permute.xlu0 %176 }
  0xb6   : > { %v182_v24 = vadd.f32 %v177_v15, %v172_v19  ;;  %v362_v15 = vld [vmem:[#allocation2 + $0xe8] sm:$0xff] }
  0xb8   : > { %v631_v34 = vtrunc.f32 %v182_v24  ;;  %v364_v24 = vld [vmem:[#allocation2 + $0xf8] sm:$0xff] }
  0xb9   : > { %v179_v17 = vpop.permute.xlu0 %178  ;;  %v194_v18 = vpop.permute.xlu1 %193 }
  0xba   : > { %v183_v20 = vadd.f32 %v179_v17, %v173_v16  ;;  %v632_v42 = vcvt.f32.s32 %v631_v34  ;;  %v199_v43 = vmul.f32 %v194_v18, %v189_v13  ;;  %v211_v50 = vmul.f32 %v194_v18, %v899_v11  ;;  %v345_v17 = vld [vmem:[#allocation2 + $0x60] sm:$0xff]  ;;  %v346_v18 = vld [vmem:[#allocation2 + $0x68] sm:$0xff] }
  0xbb   : > { %v609_v19 = vpack.c.bf16 %v346_v18, %v345_v17  ;;  %v186_v34 = vlaneseq }
  0xbc   : > { %v633_v21 = vtrunc.f32 %v183_v20  ;;  %v243_v59 = vadd.s32 1, %v632_v42  ;;  %v273_v3 = vadd.s32 16, %v632_v42 }
  0xbd   : > { %v907_v22 = vpop.permute.xlu0 %203  ;;  %v196_v23 = vpop.permute.xlu1 %195  ;;  %v187_v37 = vand.u32 127, %v186_v34 }
  0xbe   : > { %v209_v25 = vmul.f32 %v907_v22, %v189_v13  ;;  %v910_v31 = vcvt.f32.s32 %v633_v21  ;;  %v200_v51 = vmul.f32 %v196_v23, %v190_v14  ;;  %v212_v58 = vmul.f32 %v196_v23, %v901_v12  ;;  %v363_v23 = vld [vmem:[#allocation2 + $0xf0] sm:$0xff] }
  0xbf   : > { %v303_v13 = vadd.s32 17, %v632_v42  ;;  %v213_v20 = vmul.f32 %v907_v22, %v899_v11  ;;  %v188_v40 = vadd.s32 128, %v187_v37 }
  0xc0   : > { %257 = vperm.xlu1 %691, %v209_v25   ;;  %v244_v2 = vadd.s32 1, %v910_v31  ;;  %v274_v10 = vadd.s32 16, %v910_v31  ;;  %v304_v21 = vadd.s32 17, %v910_v31  ;;  %v611_v25 = vpack.c.bf16 %v364_v24, %v363_v23 }
  0xc1   : > { %v912_v33 = vpop.permute.xlu1 %205 }
  0xc2   : > { %v210_v35 = vmul.f32 %v912_v33, %v190_v14  ;;  %v361_v14 = vld [vmem:[#allocation2 + $0xe0] sm:$0xff]  ;;  %v214_v29 = vmul.f32 %v912_v33, %v901_v12 }
  0xc3   : > { %v607_v16 = vpack.c.bf16 %v362_v15, %v361_v14 }
  0xc4   : > { %262 = vperm.xlu0 %692, %v210_v35   ;;  %219 = vperm.xlu1 %691, %v910_v31  }
  0xc5   : > { %608 = vmatprep.subr.bf16.mxu0 %v607_v16  ;;  %621 = vmatprep.subr.bf16.mxu1 %v607_v16 }
  0xc6   : > { %610 = vmatpush3.bf16.msra.mxu0 %v609_v19  ;;  %629 = vmatpush3.bf16.msra.mxu1 %v609_v19 }
  0xc7   : > { %612 = vmatprep.subr.bf16.mxu0 %v611_v25  ;;  %622 = vmatprep.subr.bf16.mxu1 %v611_v25 }
  0xc8   : > { %216 = vperm.xlu0 %692, %v632_v42   ;;  %227 = vperm.xlu1 %691, %v199_v43  }
  0xca   : > { %614 = vmatpush3.bf16.msra.mxu0 %v613_v28  ;;  %630 = vmatpush3.bf16.msra.mxu1 %v613_v28 }
  0xcc   : > { %232 = vperm.xlu0 %692, %v200_v51   ;;  %287 = vperm.xlu1 %691, %v211_v50  }
  0xd0   : > { %292 = vperm.xlu0 %692, %v212_v58   ;;  %246 = vperm.xlu1 %691, %v243_v59  }
  0xd4   : > { %249 = vperm.xlu0 %692, %v244_v2   ;;  %276 = vperm.xlu1 %691, %v273_v3  }
  0xd8   : > { %279 = vperm.xlu0 %692, %v274_v10   ;;  %306 = vperm.xlu1 %691, %v303_v13  }
  0xdc   : > { %309 = vperm.xlu0 %692, %v304_v21   ;;  %317 = vperm.xlu1 %691, %v213_v20  }
  0xe0   : > { %322 = vperm.xlu0 %692, %v214_v29  }
 0x13f   : > { %v258_v11 = vpop.permute.xlu1 %257 }
 0x143   : > { %v263_v22 = vpop.permute.xlu0 %262  ;;  %v220_v30 = vpop.permute.xlu1 %219 }
 0x144   : > { %vm223_vm6 = vcmp.eq.s32.totalorder %v187_v37, %v220_v30  ;;  %vm224_vm7 = vcmp.eq.s32.totalorder %v188_v40, %v220_v30 }
 0x147   : > { %v217_v31 = vpop.permute.xlu0 %216  ;;  %v228_v32 = vpop.permute.xlu1 %227 }
 0x148   : > { %vm221_vm2 = vcmp.eq.s32.totalorder %v187_v37, %v217_v31  ;;  %vm222_vm3 = vcmp.eq.s32.totalorder %v188_v40, %v217_v31 }
 0x149   : > { %v235_v45 = vsel %vm221_vm2, %v228_v32, 0.0  ;;  %v236_v46 = vsel %vm222_vm3, %v228_v32, 0.0 }
 0x14b   : > { %v233_v35 = vpop.permute.xlu0 %232  ;;  %v288_v36 = vpop.permute.xlu1 %287 }
 0x14c   : > { %v237_v51 = vsel %vm223_vm6, %v233_v35, 0.0  ;;  %v238_v52 = vsel %vm224_vm7, %v233_v35, 0.0 }
 0x14f   : > { %v293_v38 = vpop.permute.xlu0 %292  ;;  %v247_v39 = vpop.permute.xlu1 %246 }
 0x150   : > { %vm251_vm0 = vcmp.eq.s32.totalorder %v187_v37, %v247_v39  ;;  %vm252_vm1 = vcmp.eq.s32.totalorder %v188_v40, %v247_v39 }
 0x151   : > { %v265_v12 = vsel %vm251_vm0, %v258_v11, 0.0  ;;  %v266_v33 = vsel %vm252_vm1, %v258_v11, 0.0 }
 0x152   : > { %v269_v49 = vadd.f32 %v265_v12, %v235_v45  ;;  %v270_v50 = vadd.f32 %v266_v33, %v236_v46 }
 0x153   : > { %v250_v41 = vpop.permute.xlu0 %249  ;;  %v277_v42 = vpop.permute.xlu1 %276 }
 0x154   : > { %vm281_vm4 = vcmp.eq.s32.totalorder %v187_v37, %v277_v42  ;;  %vm282_vm5 = vcmp.eq.s32.totalorder %v188_v40, %v277_v42  ;;  %vm253_vm8 = vcmp.eq.s32.totalorder %v187_v37, %v250_v41  ;;  %vm254_vm9 = vcmp.eq.s32.totalorder %v188_v40, %v250_v41 }
 0x155   : > { %v295_v47 = vsel %vm281_vm4, %v288_v36, 0.0  ;;  %v296_v48 = vsel %vm282_vm5, %v288_v36, 0.0  ;;  %v267_v53 = vsel %vm253_vm8, %v263_v22, 0.0  ;;  %v268_v54 = vsel %vm254_vm9, %v263_v22, 0.0 }
 0x156   : > { %v299_v56 = vadd.f32 %v295_v47, %v269_v49  ;;  %v300_v58 = vadd.f32 %v296_v48, %v270_v50  ;;  %v271_v63 = vadd.f32 %v267_v53, %v237_v51  ;;  %v272_v0 = vadd.f32 %v268_v54, %v238_v52 }
 0x157   : > { %v280_v43 = vpop.permute.xlu0 %279  ;;  %v307_v44 = vpop.permute.xlu1 %306 }
 0x158   : > { %vm283_vm10 = vcmp.eq.s32.totalorder %v187_v37, %v280_v43  ;;  %vm284_vm11 = vcmp.eq.s32.totalorder %v188_v40, %v280_v43  ;;  %vm311_vm12 = vcmp.eq.s32.totalorder %v187_v37, %v307_v44  ;;  %vm312_vm13 = vcmp.eq.s32.totalorder %v188_v40, %v307_v44 }
 0x159   : > { %v297_v59 = vsel %vm283_vm10, %v293_v38, 0.0  ;;  %v298_v60 = vsel %vm284_vm11, %v293_v38, 0.0 }
 0x15a   : > { %v301_v4 = vadd.f32 %v297_v59, %v271_v63  ;;  %v302_v5 = vadd.f32 %v298_v60, %v272_v0 }
 0x15b   : > { %v310_v55 = vpop.permute.xlu0 %309  ;;  %v318_v57 = vpop.permute.xlu1 %317 }
 0x15c   : > { %v325_v61 = vsel %vm311_vm12, %v318_v57, 0.0  ;;  %v326_v62 = vsel %vm312_vm13, %v318_v57, 0.0  ;;  %vm313_vm14 = vcmp.eq.s32.totalorder %v187_v37, %v310_v55  ;;  %vm314_vm15 = vcmp.eq.s32.totalorder %v188_v40, %v310_v55 }
 0x15d   : > { %v329_v1 = vadd.f32 %v325_v61, %v299_v56  ;;  %v330_v2 = vadd.f32 %v326_v62, %v300_v58 }
 0x15f   : > { %v323_v3 = vpop.permute.xlu0 %322  ;;  %429 = vmatprep.mubr.f32.mxu0 %v330_v2 }
 0x160   : > { %v327_v6 = vsel %vm313_vm14, %v323_v3, 0.0  ;;  %v328_v7 = vsel %vm314_vm15, %v323_v3, 0.0  ;;  %430 = vmatmul.mubr.f32.vlgmr.msra.gmra.mrb[0].mxu0 %v329_v1 }
 0x161   : > { %v331_v8 = vadd.f32 %v327_v6, %v301_v4  ;;  %v332_v9 = vadd.f32 %v328_v7, %v302_v5 }
 0x163   : > { %434 = vmatprep.mubr.f32.mxu1 %v332_v9 }
 0x164   : > { %435 = vmatmul.mubr.f32.vlgmr.msra.gmra.mrb[0].mxu1 %v331_v8 }
 0x233   : > { %v577_v10 = vpop.f32.mrb[0].mxu0 }
 0x234   : > { %v578_v13 = vpop.f32.mrb[1].mxu0 }
 0x235   : > { %v579_v14 = vadd.f32 %v578_v13, %v577_v10 }
 0x237   : > { %440 = vst [vmem:[%s152_s26] sm:$0xff] %v579_v14  ;;  %v580_v15 = vpop.f32.mrb[0].mxu1 }
 0x238   : > { %v581_v16 = vpop.f32.mrb[1].mxu1 }
 0x239   : > { %v582_v17 = vadd.f32 %v581_v16, %v580_v15 }
 0x23b   : > { %441 = vst [vmem:[%s152_s26 + $0x8] sm:$0xff] %v582_v17 }
 0x23c   : > { %734 = shalt.err (!%p731_p7)
}
 0x23d   : > { %s735_s8 = scalar_lea.hbm %s932_s3, 256  ;;  %s739_s17 = scalar_lea.hbm %s977_s2, 768 }
 0x23e   : > { %p736_p8 = scmp.ne.s32.totalorder %s932_s3, %s735_s8  ;;  %p740_p1 = scmp.lt.u32.totalorder %s932_s3, %s977_s2 }
 0x23f   : > { %p741_p0 = scmp.lt.u32.totalorder %s739_s17, %s735_s8  ;;  %p743_p6 = scmp.lt.u32.totalorder %s735_s8, %s932_s3 }
 0x240   : > { %p737_p11 = pnand %p736_p8, %p988_p9 }
 0x241   : > { %p742_p5 = por %p741_p0, %p740_p1 }
 0x242   : > { %p738_p13 = pneg %p737_p11 }
 0x243   : > { %p744_p10 = por %p743_p6, %p742_p5 }
 0x245   : > { %p745_p12 = pnand %p744_p10, %p738_p13 }
 0x247   : > { %748 = shalt.err (!%p745_p12)
}
 0x248   : > { %s795_s21 = smov 128   ;;  %s796_s23 = smov 8  }
 0x249   : > { %639 = dma.vmem_to_hbm [thread:$0]  (%p988_p9), %s927_s27, 256, %s932_s3, %s934_s4, %s795_s21, %s795_s21, %s796_s23  }
 0x24a PF: > { %p651_p2 = scmp.ge.s32.totalorder %s787_s12, 2  ;;  %s471_s25 = sand.u32 1, %s775_s9  }
 0x24b   : > { %p989_p3 = scmp.ne.s32.totalorder %s982_s20, 0  ;;  %s472_s26 = scalar_lea.sflag [#allocation4], %s471_s25 }
 0x24d   : > { %p646_p4 = pnand %p651_p2, %p989_p3 }
 0x24f   : > { %770 = dma.done.wait (!%p646_p4), %s472_s26, 256  }
 0x250   : > { %772 = vsyncadd (!%p646_p4), %s472_s26, 4294967040  ;;  %p13_p7 = scmp.ge.s32.totalorder %s837_s15, 5   ;;  %s990_s9 = smov %s779_s10 }
 0x251   : > { %s991_s10 = smov %s783_s11  ;;  %s992_s11 = smov %s848_s18 }
 0x252   : > { %s993_s12 = smov %s837_s15  ;;  %15 = sbr.rel (!%p13_p7) target bundleno = 4 (0x4), region = 68 }
 0x259   :  { %477 = vsyncpa [#allocation3], 1 }
 0x25a   :  { %479 = vsyncpa [#allocation3 + $0x1], 1 }
 0x25b   :  { %480 = vsyncpa [#allocation4], 1 }
 0x25c   :  { %482 = vsyncpa [#allocation4 + $0x1], 1 }

// kernel: tpu_custom_call.1
= control target key start
LH: loop header
LB: loop body
LE: loop exit
PB: predicated region body
PF: predicated region fallthrough
CT: control target
= control target key end

     0   :  { %7 = vsyncpa [#allocation3], 0  ;;  %s975_s0 = inlined_call_operand.vmem [shape: f32[48,2], index: 0, kind: input, shape index: {}]   ;;  %s976_s1 = inlined_call_operand.hbm [shape: f32[256,128], index: 1, kind: input, shape index: {}]   ;;  %s977_s2 = inlined_call_operand.hbm [shape: f32[48,128], index: 2, kind: output, shape index: {}]  }
   0x1   :  { %8 = vsyncpa [#allocation4], 0 }
   0x2   :  { %10 = vsyncpa [#allocation4 + $0x1], 0  ;;  %s812_s9 = smov 0   ;;  %s814_s10 = smov 0  }
   0x3   :  { %s816_s11 = smov 0   ;;  %s818_s12 = smov 0  }
   0x4 LB: > { %s833_s13 = sadd.s32 4294967295, %s787_s12   ;;  %s530_s14 = sadd.s32 4294967294, %s787_s12   ;;  %s787_s12 = sphi %s818_s12, %s993_s12   ;;  %s783_s11 = sphi %s816_s11, %s992_s11   ;;  %s779_s10 = sphi %s814_s10, %s991_s10   ;;  %s775_s9 = sphi %s812_s9, %s990_s9  }
   0x5   : > { %s837_s15 = sadd.s32 1, %s787_s12   ;;  %s70_s16 = sadd.s32 1, %s783_s11 }
   0x6   : > { %s67_s17 = ssub.s32 %s787_s12, %s837_s15  ;;  %p80_p0 = scmp.ne.s32.totalorder %s783_s11, %s779_s10 }
   0x7   : > { %p68_p1 = scmp.eq.s32.totalorder %s67_s17, 0  ;;  %p81_p2 = scmp.eq.s32.totalorder %s833_s13, 2 }
   0x8   : > { %p86_p3 = scmp.ne.s32.totalorder %s779_s10, %s775_s9  ;;  %p87_p4 = scmp.eq.s32.totalorder %s530_s14, 2 }
   0x9   : > { %s848_s18 = scalar_select %p68_p1, %s783_s11, %s70_s16  }
   0xa   : > { %p850_p5 = por %p81_p2, %p80_p0  ;;  %p854_p6 = por %p87_p4, %p86_p3 }
   0xb   : > { %p531_p7 = scmp.ge.s32.totalorder %s787_s12, 1  ;;  %p94_p8 = scmp.lt.s32.totalorder %s787_s12, 4 }
   0xc   : > { %s981_s19 = scalar_select %p850_p5, 1, 0 }
   0xd   : > { %s982_s20 = scalar_select %p854_p6, 1, 0 }
   0xe   : > { %p978_p9 = scmp.eq.s32.totalorder %s833_s13, 0  ;;  %p861_p10 = pnand %p531_p7, %p94_p8 }
   0xf   : > { %s789_s22 = smov [#allocation2]   ;;  %s693_s27 = scalar_lea.hbm %s976_s1, 4096 }
  0x10   : > { %s983_s21 = scalar_select %p861_p10, 1, 0 }
  0x11   : > { %s106_s23 = sshll.u32 %s789_s22, 4  ;;  %p641_p11 = pneg %p861_p10  ;;  %s107_s23 = int_to_ptr.vmem [resolvable:$true] %s106_s23 }
  0x12   : > { %p694_p13 = scmp.ne.s32.totalorder %s976_s1, %s693_s27  ;;  %p700_p3 = scmp.lt.u32.totalorder %s693_s27, %s976_s1 }
  0x13   : > { %p869_p12 = pnand %p978_p9, %p641_p11 }
  0x15   : > { %p695_p0 = pneg %p869_p12 }
  0x17   : > { %p696_p1 = pnand %p695_p0, %p694_p13 }
  0x19   : > { %p697_p2 = pneg %p696_p1 }
  0x1b   : > { %p702_p4 = pnand %p700_p3, %p697_p2 }
  0x1d   : > { %705 = shalt.err (!%p702_p4)
}
  0x1e   : > { %s706_s4 = scalar_lea.vmem %s107_s23, 4096  ;;  %p714_p9 = scmp.lt.s32.totalorder %s107_s23, %s107_s23 }
  0x1f   : > { %p707_p7 = scmp.ne.s32.totalorder %s107_s23, %s706_s4  ;;  %p715_p6 = scmp.lt.s32.totalorder %s706_s4, %s706_s4 }
  0x21   : > { %p709_p8 = pnand %p707_p7, %p695_p0  ;;  %p716_p5 = por %p715_p6, %p714_p9 }
  0x23   : > { %p710_p11 = pneg %p709_p8 }
  0x25   : > { %p717_p10 = pnand %p716_p5, %p710_p11 }
  0x27   : > { %720 = shalt.err (!%p717_p10)
}
  0x28   : > { %s790_s5 = smov 128   ;;  %s791_s6 = smov 8  }
  0x29   : > { %644 = dma.hbm_to_vmem [thread:$0]  (!%p869_p12), %s976_s1, 4096, %s107_s23, [#allocation3], %s790_s5, %s790_s5, %s791_s6  }
  0x2a   : > { %p985_p13 = scmp.ne.s32.totalorder %s983_s21, 0 }
  0x2b   : > { %p986_p1 = scmp.eq.s32.totalorder (!%p985_p13), %s833_s13, 0 }
  0x2c   : > { %131 = sbr.rel (%p985_p13) target bundleno = 586 (0x24a), region = 28 }
  0x33   : > { %766 = dma.done.wait (%p986_p1), [#allocation3], 4096   ;;  %p987_p0 = pmov %p986_p1 }
  0x34   : > { %s537_s14 = sshll.u32 %s833_s13, 1  ;;  %v792_v8 = vmov 0   ;;  %s793_s21 = smov 127   ;;  %v349_v26 = vld [vmem:[#allocation2 + $0x80] sm:$0xff]  ;;  %v350_v27 = vld [vmem:[#allocation2 + $0x88] sm:$0xff]  ;;  %v351_v36 = vld [vmem:[#allocation2 + $0x90] sm:$0xff] }
  0x35   : > { %768 = vsyncadd (%p987_p0), [#allocation3], 4294963200  ;;  %p154_p5 = scmp.lt.s32.totalorder %s537_s14, 5  ;;  %691 = vset.pattern.permute.xlu1 %v792_v8  ;;  %692 = vset.pattern.permute.xlu0 %v792_v8  ;;  %v583_v28 = vpack.c.bf16 %v350_v27, %v349_v26  ;;  %v333_v29 = vld [vmem:[#allocation2] sm:$0xff]  ;;  %v334_v30 = vld [vmem:[#allocation2 + $0x8] sm:$0xff]  ;;  %s150_s23 = sand.u32 1, %s779_s10  }
  0x36   : > { %v585_v32 = vpack.c.bf16 %v334_v30, %v333_v29  ;;  %v352_v37 = vld [vmem:[#allocation2 + $0x98] sm:$0xff]  ;;  %v335_v39 = vld [vmem:[#allocation2 + $0x10] sm:$0xff]  ;;  %v353_v44 = vld [vmem:[#allocation2 + $0xa0] sm:$0xff]  ;;  %s536_s25 = sshll.u32 %s150_s23, 4  ;;  %s544_s28 = sshll.u32 %s833_s13, 8 }
  0x37   : > { %s995_s14 = smov (!%p154_p5, %s537_s14), 5  ;;  %584 = vmatprep.subr.bf16.mxu0 %v583_v28  ;;  %615 = vmatprep.subr.bf16.mxu1 %v583_v28  ;;  %v587_v38 = vpack.c.bf16 %v352_v37, %v351_v36  ;;  %v336_v40 = vld [vmem:[#allocation2 + $0x18] sm:$0xff]  ;;  %v354_v45 = vld [vmem:[#allocation2 + $0xa8] sm:$0xff]  ;;  %v337_v47 = vld [vmem:[#allocation2 + $0x20] sm:$0xff]  ;;  %s152_s26 = scalar_lea.vmem [#allocation5], %s536_s25 }
  0x38   : > { %s538_s16 = sshll.u32 %s995_s14, 3  ;;  %586 = vmatpush3.bf16.msra.mxu0 %v585_v32  ;;  %623 = vmatpush3.bf16.msra.mxu1 %v585_v32  ;;  %v589_v41 = vpack.c.bf16 %v336_v40, %v335_v39  ;;  %v591_v46 = vpack.c.bf16 %v354_v45, %v353_v44  ;;  %v338_v48 = vld [vmem:[#allocation2 + $0x28] sm:$0xff]  ;;  %v355_v52 = vld [vmem:[#allocation2 + $0xb0] sm:$0xff]  ;;  %v356_v53 = vld [vmem:[#allocation2 + $0xb8] sm:$0xff]  ;;  %s456_s27 = sshll.u32 %s152_s26, 4  ;;  %s927_s27 = int_to_ptr.vmem [resolvable:$true] %s456_s27 }
  0x39   : > { %s157_s24 = scalar_lea.vmem %s975_s0, %s538_s16  ;;  %588 = vmatprep.subr.bf16.mxu0 %v587_v38  ;;  %616 = vmatprep.subr.bf16.mxu1 %v587_v38  ;;  %v593_v49 = vpack.c.bf16 %v338_v48, %v337_v47  ;;  %v595_v54 = vpack.c.bf16 %v356_v53, %v355_v52  ;;  %v339_v55 = vld [vmem:[#allocation2 + $0x30] sm:$0xff]  ;;  %v340_v56 = vld [vmem:[#allocation2 + $0x38] sm:$0xff]  ;;  %v357_v60 = vld [vmem:[#allocation2 + $0xc0] sm:$0xff]  ;;  %s932_s3 = scalar_lea.hbm %s977_s2, %s544_s28 }
  0x3a   : > { %v160_v0 = vld [vmem:[%s157_s24] sm:$0xff]  ;;  %v161_v1 = vld [vmem:[%s157_s24 + $0x8] sm:$0xff]  ;;  %v597_v57 = vpack.c.bf16 %v340_v56, %v339_v55  ;;  %v344_v8 = vld [vmem:[#allocation2 + $0x58] sm:$0xff]  ;;  %s934_s4 = scalar_lea.sflag [#allocation4], %s150_s23  ;;  %s721_s5 = scalar_lea.vmem %s927_s27, 256 }
  0x3b   : > { %v162_v2 = vmul.f32 15.0, %v160_v0  ;;  %v163_v3 = vmul.f32 15.0, %v161_v1  ;;  %v358_v61 = vld [vmem:[#allocation2 + $0xc8] sm:$0xff]  ;;  %v341_v63 = vld [vmem:[#allocation2 + $0x40] sm:$0xff]  ;;  %v347_v26 = vld [vmem:[#allocation2 + $0x70] sm:$0xff]  ;;  %p722_p6 = scmp.ne.s32.totalorder %s927_s27, %s721_s5  ;;  %p988_p9 = scmp.ne.s32.totalorder %s981_s19, 0 }
  0x3c   : > { %590 = vmatpush3.bf16.msra.mxu0 %v589_v41  ;;  %624 = vmatpush3.bf16.msra.mxu1 %v589_v41  ;;  %v599_v62 = vpack.c.bf16 %v358_v61, %v357_v60  ;;  %v342_v0 = vld [vmem:[#allocation2 + $0x48] sm:$0xff]  ;;  %v348_v27 = vld [vmem:[#allocation2 + $0x78] sm:$0xff]  ;;  %s794_s13 = smov [#allocation5]  }
  0x3d   : > { %v164_v4 = vfloor.f32 %v162_v2  ;;  %v165_v5 = vfloor.f32 %v163_v3  ;;  %592 = vmatprep.subr.bf16.mxu0 %v591_v46  ;;  %617 = vmatprep.subr.bf16.mxu1 %v591_v46  ;;  %v601_v1 = vpack.c.bf16 %v342_v0, %v341_v63  ;;  %v613_v28 = vpack.c.bf16 %v348_v27, %v347_v26  ;;  %p723_p10 = pnand %p722_p6, %p988_p9  ;;  %s725_s6 = sshll.u32 %s794_s13, 4  ;;  %s726_s6 = int_to_ptr.vmem [resolvable:$false] %s725_s6 }
  0x3e   : > { %s727_s7 = scalar_lea.vmem %s726_s6, 512  ;;  %p728_p2 = scmp.lt.s32.totalorder %s927_s27, %s726_s6 }
  0x3f   : > { %v166_v6 = vmax.f32 %v164_v4, 0.0  ;;  %v167_v7 = vmax.f32 %v165_v5, 0.0  ;;  %v359_v4 = vld [vmem:[#allocation2 + $0xd0] sm:$0xff]  ;;  %v360_v5 = vld [vmem:[#allocation2 + $0xd8] sm:$0xff]  ;;  %p724_p12 = pneg %p723_p10  ;;  %p729_p3 = scmp.lt.s32.totalorder %s727_s7, %s721_s5 }
  0x40   : > { %594 = vmatpush3.bf16.msra.mxu0 %v593_v49  ;;  %625 = vmatpush3.bf16.msra.mxu1 %v593_v49 }
  0x41   : > { %v168_v9 = vmin.f32 %v166_v6, 14.0  ;;  %v169_v10 = vmin.f32 %v167_v7, 14.0  ;;  %596 = vmatprep.subr.bf16.mxu0 %v595_v54  ;;  %618 = vmatprep.subr.bf16.mxu1 %v595_v54  ;;  %v603_v6 = vpack.c.bf16 %v360_v5, %v359_v4  ;;  %v343_v7 = vld [vmem:[#allocation2 + $0x50] sm:$0xff]  ;;  %p730_p4 = por %p729_p3, %p728_p2 }
  0x43   : > { %176 = vrot.lane.b32.xlu0 %v168_v9, %s793_s21  ;;  %v899_v11 = vsub.f32 %v162_v2, %v168_v9  ;;  %v901_v12 = vsub.f32 %v163_v3, %v169_v10  ;;  %v173_v16 = vmul.f32 16.0, %v169_v10  ;;  %v172_v19 = vmul.f32 16.0, %v168_v9  ;;  %p731_p7 = pnand %p730_p4, %p724_p12 }
  0x44   : > { %598 = vmatpush3.bf16.msra.mxu0 %v597_v57  ;;  %626 = vmatpush3.bf16.msra.mxu1 %v597_v57  ;;  %v605_v9 = vpack.c.bf16 %v344_v8, %v343_v7 }
  0x45   : > { %v189_v13 = vsub.f32 1.0, %v899_v11  ;;  %v190_v14 = vsub.f32 1.0, %v901_v12  ;;  %600 = vmatprep.subr.bf16.mxu0 %v599_v62  ;;  %619 = vmatprep.subr.bf16.mxu1 %v599_v62 }
  0x47   : > { %178 = vrot.lane.b32.xlu0 %v169_v10, %s793_s21  ;;  %193 = vrot.lane.b32.xlu1 %v189_v13, %s793_s21 }
  0x48   : > { %602 = vmatpush3.bf16.msra.mxu0 %v601_v1  ;;  %627 = vmatpush3.bf16.msra.mxu1 %v601_v1 }
  0x49   : > { %604 = vmatprep.subr.bf16.mxu0 %v603_v6  ;;  %620 = vmatprep.subr.bf16.mxu1 %v603_v6 }
  0x4b   : > { %203 = vrot.lane.b32.xlu0 %v899_v11, %s793_s21  ;;  %195 = vrot.lane.b32.xlu1 %v190_v14, %s793_s21 }
  0x4c   : > { %606 = vmatpush3.bf16.msra.mxu0 %v605_v9  ;;  %628 = vmatpush3.bf16.msra.mxu1 %v605_v9 }
  0x4f   : > { %205 = vrot.lane.b32.xlu1 %v901_v12, %s793_s21 }
  0xb5   : > { %v177_v15 = vpop.permute.xlu0 %176 }
  0xb6   : > { %v182_v24 = vadd.f32 %v177_v15, %v172_v19  ;;  %v362_v15 = vld [vmem:[#allocation2 + $0xe8] sm:$0xff] }
  0xb8   : > { %v631_v34 = vtrunc.f32 %v182_v24  ;;  %v364_v24 = vld [vmem:[#allocation2 + $0xf8] sm:$0xff] }
  0xb9   : > { %v179_v17 = vpop.permute.xlu0 %178  ;;  %v194_v18 = vpop.permute.xlu1 %193 }
  0xba   : > { %v183_v20 = vadd.f32 %v179_v17, %v173_v16  ;;  %v632_v42 = vcvt.f32.s32 %v631_v34  ;;  %v199_v43 = vmul.f32 %v194_v18, %v189_v13  ;;  %v211_v50 = vmul.f32 %v194_v18, %v899_v11  ;;  %v345_v17 = vld [vmem:[#allocation2 + $0x60] sm:$0xff]  ;;  %v346_v18 = vld [vmem:[#allocation2 + $0x68] sm:$0xff] }
  0xbb   : > { %v609_v19 = vpack.c.bf16 %v346_v18, %v345_v17  ;;  %v186_v34 = vlaneseq }
  0xbc   : > { %v633_v21 = vtrunc.f32 %v183_v20  ;;  %v243_v59 = vadd.s32 1, %v632_v42  ;;  %v273_v3 = vadd.s32 16, %v632_v42 }
  0xbd   : > { %v907_v22 = vpop.permute.xlu0 %203  ;;  %v196_v23 = vpop.permute.xlu1 %195  ;;  %v187_v37 = vand.u32 127, %v186_v34 }
  0xbe   : > { %v209_v25 = vmul.f32 %v907_v22, %v189_v13  ;;  %v910_v31 = vcvt.f32.s32 %v633_v21  ;;  %v200_v51 = vmul.f32 %v196_v23, %v190_v14  ;;  %v212_v58 = vmul.f32 %v196_v23, %v901_v12  ;;  %v363_v23 = vld [vmem:[#allocation2 + $0xf0] sm:$0xff] }
  0xbf   : > { %v303_v13 = vadd.s32 17, %v632_v42  ;;  %v213_v20 = vmul.f32 %v907_v22, %v899_v11  ;;  %v188_v40 = vadd.s32 128, %v187_v37 }
  0xc0   : > { %257 = vperm.xlu1 %691, %v209_v25   ;;  %v244_v2 = vadd.s32 1, %v910_v31  ;;  %v274_v10 = vadd.s32 16, %v910_v31  ;;  %v304_v21 = vadd.s32 17, %v910_v31  ;;  %v611_v25 = vpack.c.bf16 %v364_v24, %v363_v23 }
  0xc1   : > { %v912_v33 = vpop.permute.xlu1 %205 }
  0xc2   : > { %v210_v35 = vmul.f32 %v912_v33, %v190_v14  ;;  %v361_v14 = vld [vmem:[#allocation2 + $0xe0] sm:$0xff]  ;;  %v214_v29 = vmul.f32 %v912_v33, %v901_v12 }
  0xc3   : > { %v607_v16 = vpack.c.bf16 %v362_v15, %v361_v14 }
  0xc4   : > { %262 = vperm.xlu0 %692, %v210_v35   ;;  %219 = vperm.xlu1 %691, %v910_v31  }
  0xc5   : > { %608 = vmatprep.subr.bf16.mxu0 %v607_v16  ;;  %621 = vmatprep.subr.bf16.mxu1 %v607_v16 }
  0xc6   : > { %610 = vmatpush3.bf16.msra.mxu0 %v609_v19  ;;  %629 = vmatpush3.bf16.msra.mxu1 %v609_v19 }
  0xc7   : > { %612 = vmatprep.subr.bf16.mxu0 %v611_v25  ;;  %622 = vmatprep.subr.bf16.mxu1 %v611_v25 }
  0xc8   : > { %216 = vperm.xlu0 %692, %v632_v42   ;;  %227 = vperm.xlu1 %691, %v199_v43  }
  0xca   : > { %614 = vmatpush3.bf16.msra.mxu0 %v613_v28  ;;  %630 = vmatpush3.bf16.msra.mxu1 %v613_v28 }
  0xcc   : > { %232 = vperm.xlu0 %692, %v200_v51   ;;  %287 = vperm.xlu1 %691, %v211_v50  }
  0xd0   : > { %292 = vperm.xlu0 %692, %v212_v58   ;;  %246 = vperm.xlu1 %691, %v243_v59  }
  0xd4   : > { %249 = vperm.xlu0 %692, %v244_v2   ;;  %276 = vperm.xlu1 %691, %v273_v3  }
  0xd8   : > { %279 = vperm.xlu0 %692, %v274_v10   ;;  %306 = vperm.xlu1 %691, %v303_v13  }
  0xdc   : > { %309 = vperm.xlu0 %692, %v304_v21   ;;  %317 = vperm.xlu1 %691, %v213_v20  }
  0xe0   : > { %322 = vperm.xlu0 %692, %v214_v29  }
 0x13f   : > { %v258_v11 = vpop.permute.xlu1 %257 }
 0x143   : > { %v263_v22 = vpop.permute.xlu0 %262  ;;  %v220_v30 = vpop.permute.xlu1 %219 }
 0x144   : > { %vm223_vm6 = vcmp.eq.s32.totalorder %v187_v37, %v220_v30  ;;  %vm224_vm7 = vcmp.eq.s32.totalorder %v188_v40, %v220_v30 }
 0x147   : > { %v217_v31 = vpop.permute.xlu0 %216  ;;  %v228_v32 = vpop.permute.xlu1 %227 }
 0x148   : > { %vm221_vm2 = vcmp.eq.s32.totalorder %v187_v37, %v217_v31  ;;  %vm222_vm3 = vcmp.eq.s32.totalorder %v188_v40, %v217_v31 }
 0x149   : > { %v235_v45 = vsel %vm221_vm2, %v228_v32, 0.0  ;;  %v236_v46 = vsel %vm222_vm3, %v228_v32, 0.0 }
 0x14b   : > { %v233_v35 = vpop.permute.xlu0 %232  ;;  %v288_v36 = vpop.permute.xlu1 %287 }
 0x14c   : > { %v237_v51 = vsel %vm223_vm6, %v233_v35, 0.0  ;;  %v238_v52 = vsel %vm224_vm7, %v233_v35, 0.0 }
 0x14f   : > { %v293_v38 = vpop.permute.xlu0 %292  ;;  %v247_v39 = vpop.permute.xlu1 %246 }
 0x150   : > { %vm251_vm0 = vcmp.eq.s32.totalorder %v187_v37, %v247_v39  ;;  %vm252_vm1 = vcmp.eq.s32.totalorder %v188_v40, %v247_v39 }
 0x151   : > { %v265_v12 = vsel %vm251_vm0, %v258_v11, 0.0  ;;  %v266_v33 = vsel %vm252_vm1, %v258_v11, 0.0 }
 0x152   : > { %v269_v49 = vadd.f32 %v265_v12, %v235_v45  ;;  %v270_v50 = vadd.f32 %v266_v33, %v236_v46 }
 0x153   : > { %v250_v41 = vpop.permute.xlu0 %249  ;;  %v277_v42 = vpop.permute.xlu1 %276 }
 0x154   : > { %vm281_vm4 = vcmp.eq.s32.totalorder %v187_v37, %v277_v42  ;;  %vm282_vm5 = vcmp.eq.s32.totalorder %v188_v40, %v277_v42  ;;  %vm253_vm8 = vcmp.eq.s32.totalorder %v187_v37, %v250_v41  ;;  %vm254_vm9 = vcmp.eq.s32.totalorder %v188_v40, %v250_v41 }
 0x155   : > { %v295_v47 = vsel %vm281_vm4, %v288_v36, 0.0  ;;  %v296_v48 = vsel %vm282_vm5, %v288_v36, 0.0  ;;  %v267_v53 = vsel %vm253_vm8, %v263_v22, 0.0  ;;  %v268_v54 = vsel %vm254_vm9, %v263_v22, 0.0 }
 0x156   : > { %v299_v56 = vadd.f32 %v295_v47, %v269_v49  ;;  %v300_v58 = vadd.f32 %v296_v48, %v270_v50  ;;  %v271_v63 = vadd.f32 %v267_v53, %v237_v51  ;;  %v272_v0 = vadd.f32 %v268_v54, %v238_v52 }
 0x157   : > { %v280_v43 = vpop.permute.xlu0 %279  ;;  %v307_v44 = vpop.permute.xlu1 %306 }
 0x158   : > { %vm283_vm10 = vcmp.eq.s32.totalorder %v187_v37, %v280_v43  ;;  %vm284_vm11 = vcmp.eq.s32.totalorder %v188_v40, %v280_v43  ;;  %vm311_vm12 = vcmp.eq.s32.totalorder %v187_v37, %v307_v44  ;;  %vm312_vm13 = vcmp.eq.s32.totalorder %v188_v40, %v307_v44 }
 0x159   : > { %v297_v59 = vsel %vm283_vm10, %v293_v38, 0.0  ;;  %v298_v60 = vsel %vm284_vm11, %v293_v38, 0.0 }
 0x15a   : > { %v301_v4 = vadd.f32 %v297_v59, %v271_v63  ;;  %v302_v5 = vadd.f32 %v298_v60, %v272_v0 }
 0x15b   : > { %v310_v55 = vpop.permute.xlu0 %309  ;;  %v318_v57 = vpop.permute.xlu1 %317 }
 0x15c   : > { %v325_v61 = vsel %vm311_vm12, %v318_v57, 0.0  ;;  %v326_v62 = vsel %vm312_vm13, %v318_v57, 0.0  ;;  %vm313_vm14 = vcmp.eq.s32.totalorder %v187_v37, %v310_v55  ;;  %vm314_vm15 = vcmp.eq.s32.totalorder %v188_v40, %v310_v55 }
 0x15d   : > { %v329_v1 = vadd.f32 %v325_v61, %v299_v56  ;;  %v330_v2 = vadd.f32 %v326_v62, %v300_v58 }
 0x15f   : > { %v323_v3 = vpop.permute.xlu0 %322  ;;  %429 = vmatprep.mubr.f32.mxu0 %v330_v2 }
 0x160   : > { %v327_v6 = vsel %vm313_vm14, %v323_v3, 0.0  ;;  %v328_v7 = vsel %vm314_vm15, %v323_v3, 0.0  ;;  %430 = vmatmul.mubr.f32.vlgmr.msra.gmra.mrb[0].mxu0 %v329_v1 }
 0x161   : > { %v331_v8 = vadd.f32 %v327_v6, %v301_v4  ;;  %v332_v9 = vadd.f32 %v328_v7, %v302_v5 }
 0x163   : > { %434 = vmatprep.mubr.f32.mxu1 %v332_v9 }
 0x164   : > { %435 = vmatmul.mubr.f32.vlgmr.msra.gmra.mrb[0].mxu1 %v331_v8 }
 0x233   : > { %v577_v10 = vpop.f32.mrb[0].mxu0 }
 0x234   : > { %v578_v13 = vpop.f32.mrb[1].mxu0 }
 0x235   : > { %v579_v14 = vadd.f32 %v578_v13, %v577_v10 }
 0x237   : > { %440 = vst [vmem:[%s152_s26] sm:$0xff] %v579_v14  ;;  %v580_v15 = vpop.f32.mrb[0].mxu1 }
 0x238   : > { %v581_v16 = vpop.f32.mrb[1].mxu1 }
 0x239   : > { %v582_v17 = vadd.f32 %v581_v16, %v580_v15 }
 0x23b   : > { %441 = vst [vmem:[%s152_s26 + $0x8] sm:$0xff] %v582_v17 }
 0x23c   : > { %734 = shalt.err (!%p731_p7)
}
 0x23d   : > { %s735_s8 = scalar_lea.hbm %s932_s3, 256  ;;  %s739_s17 = scalar_lea.hbm %s977_s2, 768 }
 0x23e   : > { %p736_p8 = scmp.ne.s32.totalorder %s932_s3, %s735_s8  ;;  %p740_p1 = scmp.lt.u32.totalorder %s932_s3, %s977_s2 }
 0x23f   : > { %p741_p0 = scmp.lt.u32.totalorder %s739_s17, %s735_s8  ;;  %p743_p6 = scmp.lt.u32.totalorder %s735_s8, %s932_s3 }
 0x240   : > { %p737_p11 = pnand %p736_p8, %p988_p9 }
 0x241   : > { %p742_p5 = por %p741_p0, %p740_p1 }
 0x242   : > { %p738_p13 = pneg %p737_p11 }
 0x243   : > { %p744_p10 = por %p743_p6, %p742_p5 }
 0x245   : > { %p745_p12 = pnand %p744_p10, %p738_p13 }
 0x247   : > { %748 = shalt.err (!%p745_p12)
}
 0x248   : > { %s795_s21 = smov 128   ;;  %s796_s23 = smov 8  }
 0x249   : > { %639 = dma.vmem_to_hbm [thread:$0]  (%p988_p9), %s927_s27, 256, %s932_s3, %s934_s4, %s795_s21, %s795_s21, %s796_s23  }
 0x24a PF: > { %p651_p2 = scmp.ge.s32.totalorder %s787_s12, 2  ;;  %s471_s25 = sand.u32 1, %s775_s9  }
 0x24b   : > { %p989_p3 = scmp.ne.s32.totalorder %s982_s20, 0  ;;  %s472_s26 = scalar_lea.sflag [#allocation4], %s471_s25 }
 0x24d   : > { %p646_p4 = pnand %p651_p2, %p989_p3 }
 0x24f   : > { %770 = dma.done.wait (!%p646_p4), %s472_s26, 256  }
 0x250   : > { %772 = vsyncadd (!%p646_p4), %s472_s26, 4294967040  ;;  %p13_p7 = scmp.ge.s32.totalorder %s837_s15, 5   ;;  %s990_s9 = smov %s779_s10 }
 0x251   : > { %s991_s10 = smov %s783_s11  ;;  %s992_s11 = smov %s848_s18 }
 0x252   : > { %s993_s12 = smov %s837_s15  ;;  %15 = sbr.rel (!%p13_p7) target bundleno = 4 (0x4), region = 68 }
 0x259   :  { %477 = vsyncpa [#allocation3], 1 }
 0x25a   :  { %479 = vsyncpa [#allocation3 + $0x1], 1 }
 0x25b   :  { %480 = vsyncpa [#allocation4], 1 }
 0x25c   :  { %482 = vsyncpa [#allocation4 + $0x1], 1 }

</bundles_post_ra>
